<compile_context>
chip_gen: v5e
topology: v5e:2x2
jax: 0.10.0
libtpu: 0.0.40
codegen_flags: <defaults>
</compile_context>

<pallas_src>
import functools

import jax
import jax.numpy as jnp
from jax.experimental import pallas as pl
from jax.experimental.pallas import tpu as pltpu

NEG_SLOPE = 0.2  # LeakyReLU(negative_slope=0.2)


def _round_up(v: int, m: int) -> int:
    return (v + m - 1) // m * m


def _cl_kernel(xp_ref, w_ref, b_ref, o_ref, slab_ref, *, K, s, Cin, Wph, PHW, L, B):
    """Fused Conv2d(stride=s) + bias + LeakyReLU for one block of B images.

    xp_ref:   (s*s, Cin, B*L)   polyphase input; lane m = b*L + a*Wph + col  (pixels minor)
    w_ref:    (Cout, K*K*Cin)   resident weights, rows grouped per tap t = kh*K + kw
    b_ref:    (Cout, 1)         resident bias (f32)
    o_ref:    (B, Cout, L)      per-image lane-dense output (valid pixels live in lanes [0, PHW))
    slab_ref: (K*K*Cin, B*L)    im2col slab scratch
    """
    # 1) Assemble the im2col slab.  For tap (kh, kw) the window of *every* output pixel of one
    #    image is a contiguous lane span of one polyphase plane, so each copy is a plain
    #    (Cin, PHW) block move at a static lane offset.  Columns with i >= Ho or j >= Wo are
    #    "garbage" halo columns; they are computed but sliced away by the wrapper.
    for kh in range(K):
        ph, dh = kh % s, kh // s
        for kw in range(K):
            pw, dw = kw % s, kw // s
            phase = ph * s + pw
            shift = dh * Wph + dw
            r0 = (kh * K + kw) * Cin
            for b in range(B):
                slab_ref[r0:r0 + Cin, b * L:b * L + PHW] = (
                    xp_ref[phase, :, b * L + shift:b * L + shift + PHW])

    # 2) One MXU GEMM, contraction = K*K*Cin (=100), already in (Cout, pixels) orientation.
    acc = jnp.dot(w_ref[...], slab_ref[...], preferred_element_type=jnp.float32)
    acc = acc + b_ref[...].astype(jnp.float32)                 # bias, broadcast over lanes
    acc = jnp.where(acc >= 0, acc, NEG_SLOPE * acc)            # LeakyReLU(0.2), f32 epilogue
    res = acc.astype(o_ref.dtype)

    # 3) Lane-dense stores: one 128-aligned (Cout, L) tile per image (L is a multiple of 128).
    for b in range(B):
        o_ref[b] = res[:, b * L:(b + 1) * L]


@functools.partial(jax.jit, static_argnames=("stride", "padding"))
def cl_forward(x, weight, bias, *, stride=2, padding=2):
    """PyTorch `CL` forward: Conv2d(stride=2, padding=2) + LeakyReLU(0.2).  NCHW in / NCHW out."""
    N, Cin, H, W = x.shape
    Cout, _, K, _ = weight.shape
    s, p = stride, padding
    Ho = (H + 2 * p - K) // s + 1
    Wo = (W + 2 * p - K) // s + 1
    halo = (K - 1) // s               # max per-phase tap offset (dh / dw)
    Hph, Wph = Ho + halo, Wo + halo   # per-phase spatial extent
    PHW = Hph * Wph

    # Pad (and crop if over-padded) so the padded image is exactly (s*Hph, s*Wph); zeros beyond
    # the conv padding only ever feed discarded garbage columns.
    Hp, Wp = s * Hph, s * Wph
    x_pad = jnp.pad(x, ((0, 0), (0, 0),
                        (p, max(0, Hp - H - p)),
                        (p, max(0, Wp - W - p))))[:, :, :Hp, :Wp]

    # Polyphase, pixels-minor rearrangement (pure permutation of the padded input, no blowup):
    #   xp[ph*s + pw, c, n*L + a*Wph + b] = x_pad[n, c, s*a + ph, s*b + pw]
    xp = x_pad.reshape(N, Cin, Hph, s, Wph, s)
    xp = xp.transpose(3, 5, 1, 0, 2, 4)                        # (ph, pw, Cin, N, Hph, Wph)
    xp = xp.reshape(s * s, Cin, N, PHW)

    # Per-image lane stride: multiple of 128 (lane-dense, 128-aligned per-image offsets) with
    # room for the largest in-kernel tap shift so all slab reads stay in-bounds.
    L = _round_up(PHW + halo * Wph + halo, 128)
    xp = jnp.pad(xp, ((0, 0), (0, 0), (0, 0), (0, L - PHW))).reshape(s * s, Cin, N * L)

    # Per-tap-grouped weights: w2[co, (kh*K + kw)*Cin + ci] = weight[co, ci, kh, kw]
    w2 = weight.transpose(0, 2, 3, 1).reshape(Cout, K * K * Cin).astype(x.dtype)
    b2 = bias.reshape(Cout, 1).astype(jnp.float32)

    # Batch-block the grid: B images per grid step (largest divisor of N with B*L <= ~512 lanes).
    B = 1
    for cand in range(min(N, max(1, 512 // L)), 0, -1):
        if N % cand == 0:
            B = cand
            break

    kernel = functools.partial(_cl_kernel, K=K, s=s, Cin=Cin, Wph=Wph, PHW=PHW, L=L, B=B)

    out = pl.pallas_call(
        kernel,
        out_shape=jax.ShapeDtypeStruct((N, Cout, L), x.dtype),
        grid_spec=pltpu.PrefetchScalarGridSpec(
            num_scalar_prefetch=0,
            grid=(N // B,),
            in_specs=[
                pl.BlockSpec((s * s, Cin, B * L), lambda n: (0, 0, n)),
                pl.BlockSpec((Cout, K * K * Cin), lambda n: (0, 0)),   # resident weights
                pl.BlockSpec((Cout, 1), lambda n: (0, 0)),             # resident bias
            ],
            out_specs=pl.BlockSpec((B, Cout, L), lambda n: (n, 0, 0)),
            scratch_shapes=[pltpu.VMEM((K * K * Cin, B * L), x.dtype)],
        ),
        compiler_params=pltpu.CompilerParams(dimension_semantics=("parallel",)),
    )(xp, w2, b2)

    # Drop the halo ("garbage") columns: plain slices + reshape, no HBM transpose.
    return out[:, :, :PHW].reshape(N, Cout, Hph, Wph)[:, :, :Ho, :Wo]


def _reference(x, weight, bias, *, stride=2, padding=2):
    out = jax.lax.conv_general_dilated(
        x, weight,
        window_strides=(stride, stride),
        padding=[(padding, padding), (padding, padding)],
        dimension_numbers=("NCHW", "OIHW", "NCHW"),
    )
    out = out + bias.reshape(1, -1, 1, 1)
    return jnp.where(out >= 0, out, NEG_SLOPE * out)


if __name__ == "__main__":
    key = jax.random.PRNGKey(0)
    kx, kw, kb = jax.random.split(key, 3)

    # Shapes consistent with CL(in_channels=4, out_channels=8, kernel_size=5)
    N, Cin, H, W = 2, 4, 16, 16
    Cout, K = 8, 5

    x = jax.random.normal(kx, (N, Cin, H, W), dtype=jnp.float32)
    fan_in = Cin * K * K
    bound = 1.0 / (fan_in ** 0.5)
    weight = jax.random.uniform(kw, (Cout, Cin, K, K), jnp.float32, -bound, bound)
    bias = jax.random.uniform(kb, (Cout,), jnp.float32, -bound, bound)

    out = jax.block_until_ready(cl_forward(x, weight, bias))

    ref = _reference(x, weight, bias)
    assert out.shape == ref.shape, (out.shape, ref.shape)
    err = float(jnp.max(jnp.abs(out - ref)))
    assert jnp.allclose(out, ref, atol=1e-4, rtol=1e-4), err

    print("KERNEL_OK")
</pallas_src>

<mosaic_0001>
module attributes {stable_mosaic.version = 11 : i64} {
  func.func @_cl_kernel(%arg0: i32, %arg1: memref<4x4x256xf32, #tpu.memory_space<vmem>>, %arg2: memref<8x100xf32, #tpu.memory_space<vmem>>, %arg3: memref<8x1xf32, #tpu.memory_space<vmem>>, %arg4: memref<2x8x128xf32, #tpu.memory_space<vmem>>, %arg5: memref<100x256xf32, #tpu.memory_space<vmem>>) attributes {dimension_semantics = [#tpu.dimension_semantics<parallel>], iteration_bounds = array<i64: 1>, scalar_prefetch = 0 : i64, scratch_operands = 1 : i64, tpu.core_type = #tpu.core_type<tc>, window_params = [{transform_indices = @transform_0, window_bounds = array<i64: 4, 4, 256>}, {pipeline_mode = #tpu.pipeline_mode<synchronous>, transform_indices = @transform_1, window_bounds = array<i64: 8, 100>}, {pipeline_mode = #tpu.pipeline_mode<synchronous>, transform_indices = @transform_2, window_bounds = array<i64: 8, 1>}, {transform_indices = @transform_3, window_bounds = array<i64: 2, 8, 128>}]} {
    %c0 = arith.constant 0 : index
    %c0_0 = arith.constant 0 : index
    %c0_1 = arith.constant 0 : index
    %0 = vector.load %arg1[%c0, %c0_0, %c0_1] : memref<4x4x256xf32, #tpu.memory_space<vmem>>, vector<1x4x100xf32>
    %1 = vector.shape_cast %0 : vector<1x4x100xf32> to vector<4x100xf32>
    %c0_2 = arith.constant 0 : index
    %c0_3 = arith.constant 0 : index
    %2 = vector.load %arg5[%c0_2, %c0_3] : memref<100x256xf32, #tpu.memory_space<vmem>>, vector<4x100xf32>
    tpu.vector_store %arg5[%c0_2, %c0_3], %1 {strides = array<i32>} : memref<100x256xf32, #tpu.memory_space<vmem>>, vector<4x100xf32>,
    %c0_4 = arith.constant 0 : index
    %c0_5 = arith.constant 0 : index
    %c128 = arith.constant 128 : index
    %3 = vector.load %arg1[%c0_4, %c0_5, %c128] : memref<4x4x256xf32, #tpu.memory_space<vmem>>, vector<1x4x100xf32>
    %4 = vector.shape_cast %3 : vector<1x4x100xf32> to vector<4x100xf32>
    %c0_6 = arith.constant 0 : index
    %c128_7 = arith.constant 128 : index
    %5 = vector.load %arg5[%c0_6, %c128_7] : memref<100x256xf32, #tpu.memory_space<vmem>>, vector<4x100xf32>
    tpu.vector_store %arg5[%c0_6, %c128_7], %4 {strides = array<i32>} : memref<100x256xf32, #tpu.memory_space<vmem>>, vector<4x100xf32>,
    %c1 = arith.constant 1 : index
    %c0_8 = arith.constant 0 : index
    %c0_9 = arith.constant 0 : index
    %6 = vector.load %arg1[%c1, %c0_8, %c0_9] : memref<4x4x256xf32, #tpu.memory_space<vmem>>, vector<1x4x100xf32>
    %7 = vector.shape_cast %6 : vector<1x4x100xf32> to vector<4x100xf32>
    %c4 = arith.constant 4 : index
    %c0_10 = arith.constant 0 : index
    %8 = vector.load %arg5[%c4, %c0_10] : memref<100x256xf32, #tpu.memory_space<vmem>>, vector<4x100xf32>
    tpu.vector_store %arg5[%c4, %c0_10], %7 {strides = array<i32>} : memref<100x256xf32, #tpu.memory_space<vmem>>, vector<4x100xf32>,
    %c1_11 = arith.constant 1 : index
    %c0_12 = arith.constant 0 : index
    %c128_13 = arith.constant 128 : index
    %9 = vector.load %arg1[%c1_11, %c0_12, %c128_13] : memref<4x4x256xf32, #tpu.memory_space<vmem>>, vector<1x4x100xf32>
    %10 = vector.shape_cast %9 : vector<1x4x100xf32> to vector<4x100xf32>
    %c4_14 = arith.constant 4 : index
    %c128_15 = arith.constant 128 : index
    %11 = vector.load %arg5[%c4_14, %c128_15] : memref<100x256xf32, #tpu.memory_space<vmem>>, vector<4x100xf32>
    tpu.vector_store %arg5[%c4_14, %c128_15], %10 {strides = array<i32>} : memref<100x256xf32, #tpu.memory_space<vmem>>, vector<4x100xf32>,
    %c0_16 = arith.constant 0 : index
    %c0_17 = arith.constant 0 : index
    %c1_18 = arith.constant 1 : index
    %12 = vector.load %arg1[%c0_16, %c0_17, %c1_18] : memref<4x4x256xf32, #tpu.memory_space<vmem>>, vector<1x4x100xf32>
    %13 = vector.shape_cast %12 : vector<1x4x100xf32> to vector<4x100xf32>
    %c8 = arith.constant 8 : index
    %c0_19 = arith.constant 0 : index
    %14 = vector.load %arg5[%c8, %c0_19] : memref<100x256xf32, #tpu.memory_space<vmem>>, vector<4x100xf32>
    tpu.vector_store %arg5[%c8, %c0_19], %13 {strides = array<i32>} : memref<100x256xf32, #tpu.memory_space<vmem>>, vector<4x100xf32>,
    %c0_20 = arith.constant 0 : index
    %c0_21 = arith.constant 0 : index
    %c129 = arith.constant 129 : index
    %15 = vector.load %arg1[%c0_20, %c0_21, %c129] : memref<4x4x256xf32, #tpu.memory_space<vmem>>, vector<1x4x100xf32>
    %16 = vector.shape_cast %15 : vector<1x4x100xf32> to vector<4x100xf32>
    %c8_22 = arith.constant 8 : index
    %c128_23 = arith.constant 128 : index
    %17 = vector.load %arg5[%c8_22, %c128_23] : memref<100x256xf32, #tpu.memory_space<vmem>>, vector<4x100xf32>
    tpu.vector_store %arg5[%c8_22, %c128_23], %16 {strides = array<i32>} : memref<100x256xf32, #tpu.memory_space<vmem>>, vector<4x100xf32>,
    %c1_24 = arith.constant 1 : index
    %c0_25 = arith.constant 0 : index
    %c1_26 = arith.constant 1 : index
    %18 = vector.load %arg1[%c1_24, %c0_25, %c1_26] : memref<4x4x256xf32, #tpu.memory_space<vmem>>, vector<1x4x100xf32>
    %19 = vector.shape_cast %18 : vector<1x4x100xf32> to vector<4x100xf32>
    %c12 = arith.constant 12 : index
    %c0_27 = arith.constant 0 : index
    %20 = vector.load %arg5[%c12, %c0_27] : memref<100x256xf32, #tpu.memory_space<vmem>>, vector<4x100xf32>
    tpu.vector_store %arg5[%c12, %c0_27], %19 {strides = array<i32>} : memref<100x256xf32, #tpu.memory_space<vmem>>, vector<4x100xf32>,
    %c1_28 = arith.constant 1 : index
    %c0_29 = arith.constant 0 : index
    %c129_30 = arith.constant 129 : index
    %21 = vector.load %arg1[%c1_28, %c0_29, %c129_30] : memref<4x4x256xf32, #tpu.memory_space<vmem>>, vector<1x4x100xf32>
    %22 = vector.shape_cast %21 : vector<1x4x100xf32> to vector<4x100xf32>
    %c12_31 = arith.constant 12 : index
    %c128_32 = arith.constant 128 : index
    %23 = vector.load %arg5[%c12_31, %c128_32] : memref<100x256xf32, #tpu.memory_space<vmem>>, vector<4x100xf32>
    tpu.vector_store %arg5[%c12_31, %c128_32], %22 {strides = array<i32>} : memref<100x256xf32, #tpu.memory_space<vmem>>, vector<4x100xf32>,
    %c0_33 = arith.constant 0 : index
    %c0_34 = arith.constant 0 : index
    %c2 = arith.constant 2 : index
    %24 = vector.load %arg1[%c0_33, %c0_34, %c2] : memref<4x4x256xf32, #tpu.memory_space<vmem>>, vector<1x4x100xf32>
    %25 = vector.shape_cast %24 : vector<1x4x100xf32> to vector<4x100xf32>
    %c16 = arith.constant 16 : index
    %c0_35 = arith.constant 0 : index
    %26 = vector.load %arg5[%c16, %c0_35] : memref<100x256xf32, #tpu.memory_space<vmem>>, vector<4x100xf32>
    tpu.vector_store %arg5[%c16, %c0_35], %25 {strides = array<i32>} : memref<100x256xf32, #tpu.memory_space<vmem>>, vector<4x100xf32>,
    %c0_36 = arith.constant 0 : index
    %c0_37 = arith.constant 0 : index
    %c130 = arith.constant 130 : index
    %27 = vector.load %arg1[%c0_36, %c0_37, %c130] : memref<4x4x256xf32, #tpu.memory_space<vmem>>, vector<1x4x100xf32>
    %28 = vector.shape_cast %27 : vector<1x4x100xf32> to vector<4x100xf32>
    %c16_38 = arith.constant 16 : index
    %c128_39 = arith.constant 128 : index
    %29 = vector.load %arg5[%c16_38, %c128_39] : memref<100x256xf32, #tpu.memory_space<vmem>>, vector<4x100xf32>
    tpu.vector_store %arg5[%c16_38, %c128_39], %28 {strides = array<i32>} : memref<100x256xf32, #tpu.memory_space<vmem>>, vector<4x100xf32>,
    %c2_40 = arith.constant 2 : index
    %c0_41 = arith.constant 0 : index
    %c0_42 = arith.constant 0 : index
    %30 = vector.load %arg1[%c2_40, %c0_41, %c0_42] : memref<4x4x256xf32, #tpu.memory_space<vmem>>, vector<1x4x100xf32>
    %31 = vector.shape_cast %30 : vector<1x4x100xf32> to vector<4x100xf32>
    %c20 = arith.constant 20 : index
    %c0_43 = arith.constant 0 : index
    %32 = vector.load %arg5[%c20, %c0_43] : memref<100x256xf32, #tpu.memory_space<vmem>>, vector<4x100xf32>
    tpu.vector_store %arg5[%c20, %c0_43], %31 {strides = array<i32>} : memref<100x256xf32, #tpu.memory_space<vmem>>, vector<4x100xf32>,
    %c2_44 = arith.constant 2 : index
    %c0_45 = arith.constant 0 : index
    %c128_46 = arith.constant 128 : index
    %33 = vector.load %arg1[%c2_44, %c0_45, %c128_46] : memref<4x4x256xf32, #tpu.memory_space<vmem>>, vector<1x4x100xf32>
    %34 = vector.shape_cast %33 : vector<1x4x100xf32> to vector<4x100xf32>
    %c20_47 = arith.constant 20 : index
    %c128_48 = arith.constant 128 : index
    %35 = vector.load %arg5[%c20_47, %c128_48] : memref<100x256xf32, #tpu.memory_space<vmem>>, vector<4x100xf32>
    tpu.vector_store %arg5[%c20_47, %c128_48], %34 {strides = array<i32>} : memref<100x256xf32, #tpu.memory_space<vmem>>, vector<4x100xf32>,
    %c3 = arith.constant 3 : index
    %c0_49 = arith.constant 0 : index
    %c0_50 = arith.constant 0 : index
    %36 = vector.load %arg1[%c3, %c0_49, %c0_50] : memref<4x4x256xf32, #tpu.memory_space<vmem>>, vector<1x4x100xf32>
    %37 = vector.shape_cast %36 : vector<1x4x100xf32> to vector<4x100xf32>
    %c24 = arith.constant 24 : index
    %c0_51 = arith.constant 0 : index
    %38 = vector.load %arg5[%c24, %c0_51] : memref<100x256xf32, #tpu.memory_space<vmem>>, vector<4x100xf32>
    tpu.vector_store %arg5[%c24, %c0_51], %37 {strides = array<i32>} : memref<100x256xf32, #tpu.memory_space<vmem>>, vector<4x100xf32>,
    %c3_52 = arith.constant 3 : index
    %c0_53 = arith.constant 0 : index
    %c128_54 = arith.constant 128 : index
    %39 = vector.load %arg1[%c3_52, %c0_53, %c128_54] : memref<4x4x256xf32, #tpu.memory_space<vmem>>, vector<1x4x100xf32>
    %40 = vector.shape_cast %39 : vector<1x4x100xf32> to vector<4x100xf32>
    %c24_55 = arith.constant 24 : index
    %c128_56 = arith.constant 128 : index
    %41 = vector.load %arg5[%c24_55, %c128_56] : memref<100x256xf32, #tpu.memory_space<vmem>>, vector<4x100xf32>
    tpu.vector_store %arg5[%c24_55, %c128_56], %40 {strides = array<i32>} : memref<100x256xf32, #tpu.memory_space<vmem>>, vector<4x100xf32>,
    %c2_57 = arith.constant 2 : index
    %c0_58 = arith.constant 0 : index
    %c1_59 = arith.constant 1 : index
    %42 = vector.load %arg1[%c2_57, %c0_58, %c1_59] : memref<4x4x256xf32, #tpu.memory_space<vmem>>, vector<1x4x100xf32>
    %43 = vector.shape_cast %42 : vector<1x4x100xf32> to vector<4x100xf32>
    %c28 = arith.constant 28 : index
    %c0_60 = arith.constant 0 : index
    %44 = vector.load %arg5[%c28, %c0_60] : memref<100x256xf32, #tpu.memory_space<vmem>>, vector<4x100xf32>
    tpu.vector_store %arg5[%c28, %c0_60], %43 {strides = array<i32>} : memref<100x256xf32, #tpu.memory_space<vmem>>, vector<4x100xf32>,
    %c2_61 = arith.constant 2 : index
    %c0_62 = arith.constant 0 : index
    %c129_63 = arith.constant 129 : index
    %45 = vector.load %arg1[%c2_61, %c0_62, %c129_63] : memref<4x4x256xf32, #tpu.memory_space<vmem>>, vector<1x4x100xf32>
    %46 = vector.shape_cast %45 : vector<1x4x100xf32> to vector<4x100xf32>
    %c28_64 = arith.constant 28 : index
    %c128_65 = arith.constant 128 : index
    %47 = vector.load %arg5[%c28_64, %c128_65] : memref<100x256xf32, #tpu.memory_space<vmem>>, vector<4x100xf32>
    tpu.vector_store %arg5[%c28_64, %c128_65], %46 {strides = array<i32>} : memref<100x256xf32, #tpu.memory_space<vmem>>, vector<4x100xf32>,
    %c3_66 = arith.constant 3 : index
    %c0_67 = arith.constant 0 : index
    %c1_68 = arith.constant 1 : index
    %48 = vector.load %arg1[%c3_66, %c0_67, %c1_68] : memref<4x4x256xf32, #tpu.memory_space<vmem>>, vector<1x4x100xf32>
    %49 = vector.shape_cast %48 : vector<1x4x100xf32> to vector<4x100xf32>
    %c32 = arith.constant 32 : index
    %c0_69 = arith.constant 0 : index
    %50 = vector.load %arg5[%c32, %c0_69] : memref<100x256xf32, #tpu.memory_space<vmem>>, vector<4x100xf32>
    tpu.vector_store %arg5[%c32, %c0_69], %49 {strides = array<i32>} : memref<100x256xf32, #tpu.memory_space<vmem>>, vector<4x100xf32>,
    %c3_70 = arith.constant 3 : index
    %c0_71 = arith.constant 0 : index
    %c129_72 = arith.constant 129 : index
    %51 = vector.load %arg1[%c3_70, %c0_71, %c129_72] : memref<4x4x256xf32, #tpu.memory_space<vmem>>, vector<1x4x100xf32>
    %52 = vector.shape_cast %51 : vector<1x4x100xf32> to vector<4x100xf32>
    %c32_73 = arith.constant 32 : index
    %c128_74 = arith.constant 128 : index
    %53 = vector.load %arg5[%c32_73, %c128_74] : memref<100x256xf32, #tpu.memory_space<vmem>>, vector<4x100xf32>
    tpu.vector_store %arg5[%c32_73, %c128_74], %52 {strides = array<i32>} : memref<100x256xf32, #tpu.memory_space<vmem>>, vector<4x100xf32>,
    %c2_75 = arith.constant 2 : index
    %c0_76 = arith.constant 0 : index
    %c2_77 = arith.constant 2 : index
    %54 = vector.load %arg1[%c2_75, %c0_76, %c2_77] : memref<4x4x256xf32, #tpu.memory_space<vmem>>, vector<1x4x100xf32>
    %55 = vector.shape_cast %54 : vector<1x4x100xf32> to vector<4x100xf32>
    %c36 = arith.constant 36 : index
    %c0_78 = arith.constant 0 : index
    %56 = vector.load %arg5[%c36, %c0_78] : memref<100x256xf32, #tpu.memory_space<vmem>>, vector<4x100xf32>
    tpu.vector_store %arg5[%c36, %c0_78], %55 {strides = array<i32>} : memref<100x256xf32, #tpu.memory_space<vmem>>, vector<4x100xf32>,
    %c2_79 = arith.constant 2 : index
    %c0_80 = arith.constant 0 : index
    %c130_81 = arith.constant 130 : index
    %57 = vector.load %arg1[%c2_79, %c0_80, %c130_81] : memref<4x4x256xf32, #tpu.memory_space<vmem>>, vector<1x4x100xf32>
    %58 = vector.shape_cast %57 : vector<1x4x100xf32> to vector<4x100xf32>
    %c36_82 = arith.constant 36 : index
    %c128_83 = arith.constant 128 : index
    %59 = vector.load %arg5[%c36_82, %c128_83] : memref<100x256xf32, #tpu.memory_space<vmem>>, vector<4x100xf32>
    tpu.vector_store %arg5[%c36_82, %c128_83], %58 {strides = array<i32>} : memref<100x256xf32, #tpu.memory_space<vmem>>, vector<4x100xf32>,
    %c0_84 = arith.constant 0 : index
    %c0_85 = arith.constant 0 : index
    %c10 = arith.constant 10 : index
    %60 = vector.load %arg1[%c0_84, %c0_85, %c10] : memref<4x4x256xf32, #tpu.memory_space<vmem>>, vector<1x4x100xf32>
    %61 = vector.shape_cast %60 : vector<1x4x100xf32> to vector<4x100xf32>
    %c40 = arith.constant 40 : index
    %c0_86 = arith.constant 0 : index
    %62 = vector.load %arg5[%c40, %c0_86] : memref<100x256xf32, #tpu.memory_space<vmem>>, vector<4x100xf32>
    tpu.vector_store %arg5[%c40, %c0_86], %61 {strides = array<i32>} : memref<100x256xf32, #tpu.memory_space<vmem>>, vector<4x100xf32>,
    %c0_87 = arith.constant 0 : index
    %c0_88 = arith.constant 0 : index
    %c138 = arith.constant 138 : index
    %63 = vector.load %arg1[%c0_87, %c0_88, %c138] : memref<4x4x256xf32, #tpu.memory_space<vmem>>, vector<1x4x100xf32>
    %64 = vector.shape_cast %63 : vector<1x4x100xf32> to vector<4x100xf32>
    %c40_89 = arith.constant 40 : index
    %c128_90 = arith.constant 128 : index
    %65 = vector.load %arg5[%c40_89, %c128_90] : memref<100x256xf32, #tpu.memory_space<vmem>>, vector<4x100xf32>
    tpu.vector_store %arg5[%c40_89, %c128_90], %64 {strides = array<i32>} : memref<100x256xf32, #tpu.memory_space<vmem>>, vector<4x100xf32>,
    %c1_91 = arith.constant 1 : index
    %c0_92 = arith.constant 0 : index
    %c10_93 = arith.constant 10 : index
    %66 = vector.load %arg1[%c1_91, %c0_92, %c10_93] : memref<4x4x256xf32, #tpu.memory_space<vmem>>, vector<1x4x100xf32>
    %67 = vector.shape_cast %66 : vector<1x4x100xf32> to vector<4x100xf32>
    %c44 = arith.constant 44 : index
    %c0_94 = arith.constant 0 : index
    %68 = vector.load %arg5[%c44, %c0_94] : memref<100x256xf32, #tpu.memory_space<vmem>>, vector<4x100xf32>
    tpu.vector_store %arg5[%c44, %c0_94], %67 {strides = array<i32>} : memref<100x256xf32, #tpu.memory_space<vmem>>, vector<4x100xf32>,
    %c1_95 = arith.constant 1 : index
    %c0_96 = arith.constant 0 : index
    %c138_97 = arith.constant 138 : index
    %69 = vector.load %arg1[%c1_95, %c0_96, %c138_97] : memref<4x4x256xf32, #tpu.memory_space<vmem>>, vector<1x4x100xf32>
    %70 = vector.shape_cast %69 : vector<1x4x100xf32> to vector<4x100xf32>
    %c44_98 = arith.constant 44 : index
    %c128_99 = arith.constant 128 : index
    %71 = vector.load %arg5[%c44_98, %c128_99] : memref<100x256xf32, #tpu.memory_space<vmem>>, vector<4x100xf32>
    tpu.vector_store %arg5[%c44_98, %c128_99], %70 {strides = array<i32>} : memref<100x256xf32, #tpu.memory_space<vmem>>, vector<4x100xf32>,
    %c0_100 = arith.constant 0 : index
    %c0_101 = arith.constant 0 : index
    %c11 = arith.constant 11 : index
    %72 = vector.load %arg1[%c0_100, %c0_101, %c11] : memref<4x4x256xf32, #tpu.memory_space<vmem>>, vector<1x4x100xf32>
    %73 = vector.shape_cast %72 : vector<1x4x100xf32> to vector<4x100xf32>
    %c48 = arith.constant 48 : index
    %c0_102 = arith.constant 0 : index
    %74 = vector.load %arg5[%c48, %c0_102] : memref<100x256xf32, #tpu.memory_space<vmem>>, vector<4x100xf32>
    tpu.vector_store %arg5[%c48, %c0_102], %73 {strides = array<i32>} : memref<100x256xf32, #tpu.memory_space<vmem>>, vector<4x100xf32>,
    %c0_103 = arith.constant 0 : index
    %c0_104 = arith.constant 0 : index
    %c139 = arith.constant 139 : index
    %75 = vector.load %arg1[%c0_103, %c0_104, %c139] : memref<4x4x256xf32, #tpu.memory_space<vmem>>, vector<1x4x100xf32>
    %76 = vector.shape_cast %75 : vector<1x4x100xf32> to vector<4x100xf32>
    %c48_105 = arith.constant 48 : index
    %c128_106 = arith.constant 128 : index
    %77 = vector.load %arg5[%c48_105, %c128_106] : memref<100x256xf32, #tpu.memory_space<vmem>>, vector<4x100xf32>
    tpu.vector_store %arg5[%c48_105, %c128_106], %76 {strides = array<i32>} : memref<100x256xf32, #tpu.memory_space<vmem>>, vector<4x100xf32>,
    %c1_107 = arith.constant 1 : index
    %c0_108 = arith.constant 0 : index
    %c11_109 = arith.constant 11 : index
    %78 = vector.load %arg1[%c1_107, %c0_108, %c11_109] : memref<4x4x256xf32, #tpu.memory_space<vmem>>, vector<1x4x100xf32>
    %79 = vector.shape_cast %78 : vector<1x4x100xf32> to vector<4x100xf32>
    %c52 = arith.constant 52 : index
    %c0_110 = arith.constant 0 : index
    %80 = vector.load %arg5[%c52, %c0_110] : memref<100x256xf32, #tpu.memory_space<vmem>>, vector<4x100xf32>
    tpu.vector_store %arg5[%c52, %c0_110], %79 {strides = array<i32>} : memref<100x256xf32, #tpu.memory_space<vmem>>, vector<4x100xf32>,
    %c1_111 = arith.constant 1 : index
    %c0_112 = arith.constant 0 : index
    %c139_113 = arith.constant 139 : index
    %81 = vector.load %arg1[%c1_111, %c0_112, %c139_113] : memref<4x4x256xf32, #tpu.memory_space<vmem>>, vector<1x4x100xf32>
    %82 = vector.shape_cast %81 : vector<1x4x100xf32> to vector<4x100xf32>
    %c52_114 = arith.constant 52 : index
    %c128_115 = arith.constant 128 : index
    %83 = vector.load %arg5[%c52_114, %c128_115] : memref<100x256xf32, #tpu.memory_space<vmem>>, vector<4x100xf32>
    tpu.vector_store %arg5[%c52_114, %c128_115], %82 {strides = array<i32>} : memref<100x256xf32, #tpu.memory_space<vmem>>, vector<4x100xf32>,
    %c0_116 = arith.constant 0 : index
    %c0_117 = arith.constant 0 : index
    %c12_118 = arith.constant 12 : index
    %84 = vector.load %arg1[%c0_116, %c0_117, %c12_118] : memref<4x4x256xf32, #tpu.memory_space<vmem>>, vector<1x4x100xf32>
    %85 = vector.shape_cast %84 : vector<1x4x100xf32> to vector<4x100xf32>
    %c56 = arith.constant 56 : index
    %c0_119 = arith.constant 0 : index
    %86 = vector.load %arg5[%c56, %c0_119] : memref<100x256xf32, #tpu.memory_space<vmem>>, vector<4x100xf32>
    tpu.vector_store %arg5[%c56, %c0_119], %85 {strides = array<i32>} : memref<100x256xf32, #tpu.memory_space<vmem>>, vector<4x100xf32>,
    %c0_120 = arith.constant 0 : index
    %c0_121 = arith.constant 0 : index
    %c140 = arith.constant 140 : index
    %87 = vector.load %arg1[%c0_120, %c0_121, %c140] : memref<4x4x256xf32, #tpu.memory_space<vmem>>, vector<1x4x100xf32>
    %88 = vector.shape_cast %87 : vector<1x4x100xf32> to vector<4x100xf32>
    %c56_122 = arith.constant 56 : index
    %c128_123 = arith.constant 128 : index
    %89 = vector.load %arg5[%c56_122, %c128_123] : memref<100x256xf32, #tpu.memory_space<vmem>>, vector<4x100xf32>
    tpu.vector_store %arg5[%c56_122, %c128_123], %88 {strides = array<i32>} : memref<100x256xf32, #tpu.memory_space<vmem>>, vector<4x100xf32>,
    %c2_124 = arith.constant 2 : index
    %c0_125 = arith.constant 0 : index
    %c10_126 = arith.constant 10 : index
    %90 = vector.load %arg1[%c2_124, %c0_125, %c10_126] : memref<4x4x256xf32, #tpu.memory_space<vmem>>, vector<1x4x100xf32>
    %91 = vector.shape_cast %90 : vector<1x4x100xf32> to vector<4x100xf32>
    %c60 = arith.constant 60 : index
    %c0_127 = arith.constant 0 : index
    %92 = vector.load %arg5[%c60, %c0_127] : memref<100x256xf32, #tpu.memory_space<vmem>>, vector<4x100xf32>
    tpu.vector_store %arg5[%c60, %c0_127], %91 {strides = array<i32>} : memref<100x256xf32, #tpu.memory_space<vmem>>, vector<4x100xf32>,
    %c2_128 = arith.constant 2 : index
    %c0_129 = arith.constant 0 : index
    %c138_130 = arith.constant 138 : index
    %93 = vector.load %arg1[%c2_128, %c0_129, %c138_130] : memref<4x4x256xf32, #tpu.memory_space<vmem>>, vector<1x4x100xf32>
    %94 = vector.shape_cast %93 : vector<1x4x100xf32> to vector<4x100xf32>
    %c60_131 = arith.constant 60 : index
    %c128_132 = arith.constant 128 : index
    %95 = vector.load %arg5[%c60_131, %c128_132] : memref<100x256xf32, #tpu.memory_space<vmem>>, vector<4x100xf32>
    tpu.vector_store %arg5[%c60_131, %c128_132], %94 {strides = array<i32>} : memref<100x256xf32, #tpu.memory_space<vmem>>, vector<4x100xf32>,
    %c3_133 = arith.constant 3 : index
    %c0_134 = arith.constant 0 : index
    %c10_135 = arith.constant 10 : index
    %96 = vector.load %arg1[%c3_133, %c0_134, %c10_135] : memref<4x4x256xf32, #tpu.memory_space<vmem>>, vector<1x4x100xf32>
    %97 = vector.shape_cast %96 : vector<1x4x100xf32> to vector<4x100xf32>
    %c64 = arith.constant 64 : index
    %c0_136 = arith.constant 0 : index
    %98 = vector.load %arg5[%c64, %c0_136] : memref<100x256xf32, #tpu.memory_space<vmem>>, vector<4x100xf32>
    tpu.vector_store %arg5[%c64, %c0_136], %97 {strides = array<i32>} : memref<100x256xf32, #tpu.memory_space<vmem>>, vector<4x100xf32>,
    %c3_137 = arith.constant 3 : index
    %c0_138 = arith.constant 0 : index
    %c138_139 = arith.constant 138 : index
    %99 = vector.load %arg1[%c3_137, %c0_138, %c138_139] : memref<4x4x256xf32, #tpu.memory_space<vmem>>, vector<1x4x100xf32>
    %100 = vector.shape_cast %99 : vector<1x4x100xf32> to vector<4x100xf32>
    %c64_140 = arith.constant 64 : index
    %c128_141 = arith.constant 128 : index
    %101 = vector.load %arg5[%c64_140, %c128_141] : memref<100x256xf32, #tpu.memory_space<vmem>>, vector<4x100xf32>
    tpu.vector_store %arg5[%c64_140, %c128_141], %100 {strides = array<i32>} : memref<100x256xf32, #tpu.memory_space<vmem>>, vector<4x100xf32>,
    %c2_142 = arith.constant 2 : index
    %c0_143 = arith.constant 0 : index
    %c11_144 = arith.constant 11 : index
    %102 = vector.load %arg1[%c2_142, %c0_143, %c11_144] : memref<4x4x256xf32, #tpu.memory_space<vmem>>, vector<1x4x100xf32>
    %103 = vector.shape_cast %102 : vector<1x4x100xf32> to vector<4x100xf32>
    %c68 = arith.constant 68 : index
    %c0_145 = arith.constant 0 : index
    %104 = vector.load %arg5[%c68, %c0_145] : memref<100x256xf32, #tpu.memory_space<vmem>>, vector<4x100xf32>
    tpu.vector_store %arg5[%c68, %c0_145], %103 {strides = array<i32>} : memref<100x256xf32, #tpu.memory_space<vmem>>, vector<4x100xf32>,
    %c2_146 = arith.constant 2 : index
    %c0_147 = arith.constant 0 : index
    %c139_148 = arith.constant 139 : index
    %105 = vector.load %arg1[%c2_146, %c0_147, %c139_148] : memref<4x4x256xf32, #tpu.memory_space<vmem>>, vector<1x4x100xf32>
    %106 = vector.shape_cast %105 : vector<1x4x100xf32> to vector<4x100xf32>
    %c68_149 = arith.constant 68 : index
    %c128_150 = arith.constant 128 : index
    %107 = vector.load %arg5[%c68_149, %c128_150] : memref<100x256xf32, #tpu.memory_space<vmem>>, vector<4x100xf32>
    tpu.vector_store %arg5[%c68_149, %c128_150], %106 {strides = array<i32>} : memref<100x256xf32, #tpu.memory_space<vmem>>, vector<4x100xf32>,
    %c3_151 = arith.constant 3 : index
    %c0_152 = arith.constant 0 : index
    %c11_153 = arith.constant 11 : index
    %108 = vector.load %arg1[%c3_151, %c0_152, %c11_153] : memref<4x4x256xf32, #tpu.memory_space<vmem>>, vector<1x4x100xf32>
    %109 = vector.shape_cast %108 : vector<1x4x100xf32> to vector<4x100xf32>
    %c72 = arith.constant 72 : index
    %c0_154 = arith.constant 0 : index
    %110 = vector.load %arg5[%c72, %c0_154] : memref<100x256xf32, #tpu.memory_space<vmem>>, vector<4x100xf32>
    tpu.vector_store %arg5[%c72, %c0_154], %109 {strides = array<i32>} : memref<100x256xf32, #tpu.memory_space<vmem>>, vector<4x100xf32>,
    %c3_155 = arith.constant 3 : index
    %c0_156 = arith.constant 0 : index
    %c139_157 = arith.constant 139 : index
    %111 = vector.load %arg1[%c3_155, %c0_156, %c139_157] : memref<4x4x256xf32, #tpu.memory_space<vmem>>, vector<1x4x100xf32>
    %112 = vector.shape_cast %111 : vector<1x4x100xf32> to vector<4x100xf32>
    %c72_158 = arith.constant 72 : index
    %c128_159 = arith.constant 128 : index
    %113 = vector.load %arg5[%c72_158, %c128_159] : memref<100x256xf32, #tpu.memory_space<vmem>>, vector<4x100xf32>
    tpu.vector_store %arg5[%c72_158, %c128_159], %112 {strides = array<i32>} : memref<100x256xf32, #tpu.memory_space<vmem>>, vector<4x100xf32>,
    %c2_160 = arith.constant 2 : index
    %c0_161 = arith.constant 0 : index
    %c12_162 = arith.constant 12 : index
    %114 = vector.load %arg1[%c2_160, %c0_161, %c12_162] : memref<4x4x256xf32, #tpu.memory_space<vmem>>, vector<1x4x100xf32>
    %115 = vector.shape_cast %114 : vector<1x4x100xf32> to vector<4x100xf32>
    %c76 = arith.constant 76 : index
    %c0_163 = arith.constant 0 : index
    %116 = vector.load %arg5[%c76, %c0_163] : memref<100x256xf32, #tpu.memory_space<vmem>>, vector<4x100xf32>
    tpu.vector_store %arg5[%c76, %c0_163], %115 {strides = array<i32>} : memref<100x256xf32, #tpu.memory_space<vmem>>, vector<4x100xf32>,
    %c2_164 = arith.constant 2 : index
    %c0_165 = arith.constant 0 : index
    %c140_166 = arith.constant 140 : index
    %117 = vector.load %arg1[%c2_164, %c0_165, %c140_166] : memref<4x4x256xf32, #tpu.memory_space<vmem>>, vector<1x4x100xf32>
    %118 = vector.shape_cast %117 : vector<1x4x100xf32> to vector<4x100xf32>
    %c76_167 = arith.constant 76 : index
    %c128_168 = arith.constant 128 : index
    %119 = vector.load %arg5[%c76_167, %c128_168] : memref<100x256xf32, #tpu.memory_space<vmem>>, vector<4x100xf32>
    tpu.vector_store %arg5[%c76_167, %c128_168], %118 {strides = array<i32>} : memref<100x256xf32, #tpu.memory_space<vmem>>, vector<4x100xf32>,
    %c0_169 = arith.constant 0 : index
    %c0_170 = arith.constant 0 : index
    %c20_171 = arith.constant 20 : index
    %120 = vector.load %arg1[%c0_169, %c0_170, %c20_171] : memref<4x4x256xf32, #tpu.memory_space<vmem>>, vector<1x4x100xf32>
    %121 = vector.shape_cast %120 : vector<1x4x100xf32> to vector<4x100xf32>
    %c80 = arith.constant 80 : index
    %c0_172 = arith.constant 0 : index
    %122 = vector.load %arg5[%c80, %c0_172] : memref<100x256xf32, #tpu.memory_space<vmem>>, vector<4x100xf32>
    tpu.vector_store %arg5[%c80, %c0_172], %121 {strides = array<i32>} : memref<100x256xf32, #tpu.memory_space<vmem>>, vector<4x100xf32>,
    %c0_173 = arith.constant 0 : index
    %c0_174 = arith.constant 0 : index
    %c148 = arith.constant 148 : index
    %123 = vector.load %arg1[%c0_173, %c0_174, %c148] : memref<4x4x256xf32, #tpu.memory_space<vmem>>, vector<1x4x100xf32>
    %124 = vector.shape_cast %123 : vector<1x4x100xf32> to vector<4x100xf32>
    %c80_175 = arith.constant 80 : index
    %c128_176 = arith.constant 128 : index
    %125 = vector.load %arg5[%c80_175, %c128_176] : memref<100x256xf32, #tpu.memory_space<vmem>>, vector<4x100xf32>
    tpu.vector_store %arg5[%c80_175, %c128_176], %124 {strides = array<i32>} : memref<100x256xf32, #tpu.memory_space<vmem>>, vector<4x100xf32>,
    %c1_177 = arith.constant 1 : index
    %c0_178 = arith.constant 0 : index
    %c20_179 = arith.constant 20 : index
    %126 = vector.load %arg1[%c1_177, %c0_178, %c20_179] : memref<4x4x256xf32, #tpu.memory_space<vmem>>, vector<1x4x100xf32>
    %127 = vector.shape_cast %126 : vector<1x4x100xf32> to vector<4x100xf32>
    %c84 = arith.constant 84 : index
    %c0_180 = arith.constant 0 : index
    %128 = vector.load %arg5[%c84, %c0_180] : memref<100x256xf32, #tpu.memory_space<vmem>>, vector<4x100xf32>
    tpu.vector_store %arg5[%c84, %c0_180], %127 {strides = array<i32>} : memref<100x256xf32, #tpu.memory_space<vmem>>, vector<4x100xf32>,
    %c1_181 = arith.constant 1 : index
    %c0_182 = arith.constant 0 : index
    %c148_183 = arith.constant 148 : index
    %129 = vector.load %arg1[%c1_181, %c0_182, %c148_183] : memref<4x4x256xf32, #tpu.memory_space<vmem>>, vector<1x4x100xf32>
    %130 = vector.shape_cast %129 : vector<1x4x100xf32> to vector<4x100xf32>
    %c84_184 = arith.constant 84 : index
    %c128_185 = arith.constant 128 : index
    %131 = vector.load %arg5[%c84_184, %c128_185] : memref<100x256xf32, #tpu.memory_space<vmem>>, vector<4x100xf32>
    tpu.vector_store %arg5[%c84_184, %c128_185], %130 {strides = array<i32>} : memref<100x256xf32, #tpu.memory_space<vmem>>, vector<4x100xf32>,
    %c0_186 = arith.constant 0 : index
    %c0_187 = arith.constant 0 : index
    %c21 = arith.constant 21 : index
    %132 = vector.load %arg1[%c0_186, %c0_187, %c21] : memref<4x4x256xf32, #tpu.memory_space<vmem>>, vector<1x4x100xf32>
    %133 = vector.shape_cast %132 : vector<1x4x100xf32> to vector<4x100xf32>
    %c88 = arith.constant 88 : index
    %c0_188 = arith.constant 0 : index
    %134 = vector.load %arg5[%c88, %c0_188] : memref<100x256xf32, #tpu.memory_space<vmem>>, vector<4x100xf32>
    tpu.vector_store %arg5[%c88, %c0_188], %133 {strides = array<i32>} : memref<100x256xf32, #tpu.memory_space<vmem>>, vector<4x100xf32>,
    %c0_189 = arith.constant 0 : index
    %c0_190 = arith.constant 0 : index
    %c149 = arith.constant 149 : index
    %135 = vector.load %arg1[%c0_189, %c0_190, %c149] : memref<4x4x256xf32, #tpu.memory_space<vmem>>, vector<1x4x100xf32>
    %136 = vector.shape_cast %135 : vector<1x4x100xf32> to vector<4x100xf32>
    %c88_191 = arith.constant 88 : index
    %c128_192 = arith.constant 128 : index
    %137 = vector.load %arg5[%c88_191, %c128_192] : memref<100x256xf32, #tpu.memory_space<vmem>>, vector<4x100xf32>
    tpu.vector_store %arg5[%c88_191, %c128_192], %136 {strides = array<i32>} : memref<100x256xf32, #tpu.memory_space<vmem>>, vector<4x100xf32>,
    %c1_193 = arith.constant 1 : index
    %c0_194 = arith.constant 0 : index
    %c21_195 = arith.constant 21 : index
    %138 = vector.load %arg1[%c1_193, %c0_194, %c21_195] : memref<4x4x256xf32, #tpu.memory_space<vmem>>, vector<1x4x100xf32>
    %139 = vector.shape_cast %138 : vector<1x4x100xf32> to vector<4x100xf32>
    %c92 = arith.constant 92 : index
    %c0_196 = arith.constant 0 : index
    %140 = vector.load %arg5[%c92, %c0_196] : memref<100x256xf32, #tpu.memory_space<vmem>>, vector<4x100xf32>
    tpu.vector_store %arg5[%c92, %c0_196], %139 {strides = array<i32>} : memref<100x256xf32, #tpu.memory_space<vmem>>, vector<4x100xf32>,
    %c1_197 = arith.constant 1 : index
    %c0_198 = arith.constant 0 : index
    %c149_199 = arith.constant 149 : index
    %141 = vector.load %arg1[%c1_197, %c0_198, %c149_199] : memref<4x4x256xf32, #tpu.memory_space<vmem>>, vector<1x4x100xf32>
    %142 = vector.shape_cast %141 : vector<1x4x100xf32> to vector<4x100xf32>
    %c92_200 = arith.constant 92 : index
    %c128_201 = arith.constant 128 : index
    %143 = vector.load %arg5[%c92_200, %c128_201] : memref<100x256xf32, #tpu.memory_space<vmem>>, vector<4x100xf32>
    tpu.vector_store %arg5[%c92_200, %c128_201], %142 {strides = array<i32>} : memref<100x256xf32, #tpu.memory_space<vmem>>, vector<4x100xf32>,
    %c0_202 = arith.constant 0 : index
    %c0_203 = arith.constant 0 : index
    %c22 = arith.constant 22 : index
    %144 = vector.load %arg1[%c0_202, %c0_203, %c22] : memref<4x4x256xf32, #tpu.memory_space<vmem>>, vector<1x4x100xf32>
    %145 = vector.shape_cast %144 : vector<1x4x100xf32> to vector<4x100xf32>
    %c96 = arith.constant 96 : index
    %c0_204 = arith.constant 0 : index
    %146 = vector.load %arg5[%c96, %c0_204] : memref<100x256xf32, #tpu.memory_space<vmem>>, vector<4x100xf32>
    tpu.vector_store %arg5[%c96, %c0_204], %145 {strides = array<i32>} : memref<100x256xf32, #tpu.memory_space<vmem>>, vector<4x100xf32>,
    %c0_205 = arith.constant 0 : index
    %c0_206 = arith.constant 0 : index
    %c150 = arith.constant 150 : index
    %147 = vector.load %arg1[%c0_205, %c0_206, %c150] : memref<4x4x256xf32, #tpu.memory_space<vmem>>, vector<1x4x100xf32>
    %148 = vector.shape_cast %147 : vector<1x4x100xf32> to vector<4x100xf32>
    %c96_207 = arith.constant 96 : index
    %c128_208 = arith.constant 128 : index
    %149 = vector.load %arg5[%c96_207, %c128_208] : memref<100x256xf32, #tpu.memory_space<vmem>>, vector<4x100xf32>
    tpu.vector_store %arg5[%c96_207, %c128_208], %148 {strides = array<i32>} : memref<100x256xf32, #tpu.memory_space<vmem>>, vector<4x100xf32>,
    %c0_209 = arith.constant 0 : index
    %c0_210 = arith.constant 0 : index
    %150 = vector.load %arg2[%c0_209, %c0_210] : memref<8x100xf32, #tpu.memory_space<vmem>>, vector<8x100xf32>
    %c0_211 = arith.constant 0 : index
    %c0_212 = arith.constant 0 : index
    %151 = vector.load %arg5[%c0_211, %c0_212] : memref<100x256xf32, #tpu.memory_space<vmem>>, vector<100x256xf32>
    %cst = arith.constant dense<0.000000e+00> : vector<8x256xf32>
    %152 = tpu.matmul %150, %151, %cst {dimension_numbers = #tpu.dot_dimension_numbers<[1], [0], [0], [1], [0, 0, 1, 1], [], []>} : vector<8x100xf32>, vector<100x256xf32>, vector<8x256xf32> -> vector<8x256xf32>
    %c0_213 = arith.constant 0 : index
    %c0_214 = arith.constant 0 : index
    %153 = vector.load %arg3[%c0_213, %c0_214] : memref<8x1xf32, #tpu.memory_space<vmem>>, vector<8x1xf32>
    %154 = vector.broadcast %153 : vector<8x1xf32> to vector<8x256xf32>
    %155 = arith.addf %152, %154 : vector<8x256xf32>
    %cst_215 = arith.constant 0.000000e+00 : f32
    %156 = vector.broadcast %cst_215 : f32 to vector<8x256xf32>
    %157 = arith.cmpf oge, %155, %156 : vector<8x256xf32>
    %cst_216 = arith.constant 2.000000e-01 : f32
    %158 = vector.broadcast %cst_216 : f32 to vector<8x256xf32>
    %159 = arith.mulf %158, %155 : vector<8x256xf32>
    %160 = arith.select %157, %155, %159 : vector<8x256xi1>, vector<8x256xf32>
    %161 = vector.extract_strided_slice %160 {offsets = [0, 0], sizes = [8, 128], strides = [1, 1]} : vector<8x256xf32> to vector<8x128xf32>
    %c0_217 = arith.constant 0 : index
    %c0_218 = arith.constant 0 : index
    %c0_219 = arith.constant 0 : index
    %162 = vector.load %arg4[%c0_217, %c0_218, %c0_219] : memref<2x8x128xf32, #tpu.memory_space<vmem>>, vector<1x8x128xf32>
    %163 = vector.shape_cast %162 : vector<1x8x128xf32> to vector<8x128xf32>
    %164 = vector.shape_cast %161 : vector<8x128xf32> to vector<1x8x128xf32>
    tpu.vector_store %arg4[%c0_217, %c0_218, %c0_219], %164 {strides = array<i32>} : memref<2x8x128xf32, #tpu.memory_space<vmem>>, vector<1x8x128xf32>,
    %165 = vector.extract_strided_slice %160 {offsets = [0, 128], sizes = [8, 128], strides = [1, 1]} : vector<8x256xf32> to vector<8x128xf32>
    %c1_220 = arith.constant 1 : index
    %c0_221 = arith.constant 0 : index
    %c0_222 = arith.constant 0 : index
    %166 = vector.load %arg4[%c1_220, %c0_221, %c0_222] : memref<2x8x128xf32, #tpu.memory_space<vmem>>, vector<1x8x128xf32>
    %167 = vector.shape_cast %166 : vector<1x8x128xf32> to vector<8x128xf32>
    %168 = vector.shape_cast %165 : vector<8x128xf32> to vector<1x8x128xf32>
    tpu.vector_store %arg4[%c1_220, %c0_221, %c0_222], %168 {strides = array<i32>} : memref<2x8x128xf32, #tpu.memory_space<vmem>>, vector<1x8x128xf32>,
    return
  }
  func.func @transform_0(%arg0: i32) -> (i32, i32, i32) {
    %c0_i32 = arith.constant 0 : i32
    %c0_i32_0 = arith.constant 0 : i32
    %c0_i32_1 = arith.constant 0 : i32
    return %c0_i32, %c0_i32_0, %arg0 : i32, i32, i32
  }
  func.func @transform_1(%arg0: i32) -> (i32, i32) {
    %c0_i32 = arith.constant 0 : i32
    %c0_i32_0 = arith.constant 0 : i32
    %c0_i32_1 = arith.constant 0 : i32
    return %c0_i32, %c0_i32_0 : i32, i32
  }
  func.func @transform_2(%arg0: i32) -> (i32, i32) {
    %c0_i32 = arith.constant 0 : i32
    %c0_i32_0 = arith.constant 0 : i32
    %c0_i32_1 = arith.constant 0 : i32
    return %c0_i32, %c0_i32_0 : i32, i32
  }
  func.func @transform_3(%arg0: i32) -> (i32, i32, i32) {
    %c0_i32 = arith.constant 0 : i32
    %c0_i32_0 = arith.constant 0 : i32
    %c0_i32_1 = arith.constant 0 : i32
    return %arg0, %c0_i32, %c0_i32_0 : i32, i32, i32
  }
}

</mosaic_0001>

<bundles_post_ra>
// kernel: cl_forward.1
= control target key start
LH: loop header
LB: loop body
LE: loop exit
PB: predicated region body
PF: predicated region fallthrough
CT: control target
= control target key end

     0   :  { %s555_s13 = smov 127   ;;  %s556_s18 = smov 126   ;;  %vm15_vm0 = vcmask 814080   ;;  %vm26_vm1 = vcmask 818180   ;;  %vm448_vm2 = vcmask 1043456   ;;  %vm444_vm3 = vcmask 818176   ;;  %s869_s0 = inlined_call_operand.vmem [shape: f32[4,4,256], index: 0, kind: input, shape index: {}]   ;;  %s870_s2 = inlined_call_operand.vmem [shape: f32[8,1], index: 2, kind: input, shape index: {}]   ;;  %s871_s1 = inlined_call_operand.vmem [shape: f32[8,100], index: 1, kind: input, shape index: {}]   ;;  %s872_s3 = inlined_call_operand.vmem [shape: f32[2,8,128], index: 3, kind: output, shape index: {}]  }
   0x1   :  { %v508_v0 = vld [vmem:[%s869_s0 + $0x8] sm:$0xf]  ;;  %v509_v1 = vld [vmem:[%s869_s0 + $0xc] sm:$0xf]  ;;  %v35_v3 = vld [vmem:[%s869_s0] sm:$0xf] }
   0x2   :  { %23 = vst [vmem:[#allocation1 + $0x1] ss:$2 sm:$0xff] %v508_v0  ;;  %v43_v5 = vld [vmem:[%s869_s0 + $0x4] sm:$0xf]  ;;  %v510_v7 = vld [vmem:[%s869_s0 + $0x8] sm:$0xf] }
   0x3   :  { %v511_v9 = vld [vmem:[%s869_s0 + $0xc] sm:$0xf]  ;;  %v69_v11 = vld [vmem:[%s869_s0] sm:$0xf]  ;;  %v77_v13 = vld [vmem:[%s869_s0 + $0x4] sm:$0xf] }
   0x4   :  { %v512_v15 = vld [vmem:[%s869_s0 + $0x10] sm:$0xf]  ;;  %v513_v17 = vld [vmem:[%s869_s0 + $0x14] sm:$0xf]  ;;  %v518_v23 = vld [vmem:[%s869_s0 + $0x18] sm:$0xf] }
   0x5   :  { %v516_v19 = vld [vmem:[%s869_s0 + $0x10] sm:$0xf]  ;;  %v517_v21 = vld [vmem:[%s869_s0 + $0x14] sm:$0xf]  ;;  %v519_v25 = vld [vmem:[%s869_s0 + $0x1c] sm:$0xf] }
   0x6   :  { %v520_v27 = vld [vmem:[%s869_s0 + $0x10] sm:$0xf]  ;;  %v521_v29 = vld [vmem:[%s869_s0 + $0x14] sm:$0xf]  ;;  %v157_v31 = vld [vmem:[%s869_s0] sm:$0xf] }
   0x7   :  { %v165_v33 = vld [vmem:[%s869_s0 + $0x4] sm:$0xf]  ;;  %s557_s23 = smov 118   ;;  %v522_v35 = vld [vmem:[%s869_s0 + $0x8] sm:$0xf]  ;;  %s558_s5 = smov 117  }
   0x8   :  { %v523_v37 = vld [vmem:[%s869_s0 + $0xc] sm:$0xf]  ;;  %v191_v39 = vld [vmem:[%s869_s0] sm:$0xf]  ;;  %v199_v41 = vld [vmem:[%s869_s0 + $0x4] sm:$0xf] }
   0x9   :  { %v590_v2 = vld.sshfl [vmem:[#allocation1] sm:$0xff pattern:$0x75316420]  ;;  %v524_v43 = vld [vmem:[%s869_s0 + $0x8] sm:$0xf]  ;;  %s559_s15 = smov 116  }
   0xa   :  { %31 = vst [vmem:[#allocation1 + $0x1] ss:$2 sm:$0xff] %v509_v1  ;;  %v525_v45 = vld [vmem:[%s869_s0 + $0xc] sm:$0xf]  ;;  %v225_v47 = vld [vmem:[%s869_s0] sm:$0xf] }
   0xb   :  { %v233_v49 = vld [vmem:[%s869_s0 + $0x4] sm:$0xf]  ;;  %v526_v51 = vld [vmem:[%s869_s0 + $0x10] sm:$0xf]  ;;  %v527_v53 = vld [vmem:[%s869_s0 + $0x14] sm:$0xf] }
   0xc   :  { %v528_v55 = vld [vmem:[%s869_s0 + $0x18] sm:$0xf]  ;;  %v529_v57 = vld [vmem:[%s869_s0 + $0x1c] sm:$0xf]  ;;  %v530_v59 = vld [vmem:[%s869_s0 + $0x10] sm:$0xf] }
   0xd   :  { %v531_v61 = vld [vmem:[%s869_s0 + $0x14] sm:$0xf]  ;;  %v532_v63 = vld [vmem:[%s869_s0 + $0x18] sm:$0xf]  ;;  %v533_v1 = vld [vmem:[%s869_s0 + $0x1c] sm:$0xf] }
   0xe   :  { %s561_s26 = smov 107   ;;  %s562_s8 = smov 106   ;;  %27 = vst.msk [vmem:[#allocation2] sm:$0xf0] %vm26_vm1, %v590_v2 }
  0x11   :  { %v595_v4 = vld.sshfl [vmem:[#allocation1] sm:$0xff pattern:$0x75316420] }
  0x12   :  { %37 = vst [vmem:[#allocation1] ss:$2 sm:$0xff] %v35_v3 }
  0x13   :  { %34 = vst.msk [vmem:[#allocation2 + $0x8] sm:$0xf0] %vm26_vm1, %v595_v4 }
  0x19   :  { %v600_v6 = vld.sshfl [vmem:[#allocation1] sm:$0xff pattern:$0x75316420] }
  0x1a   :  { %45 = vst [vmem:[#allocation1] ss:$2 sm:$0xff] %v43_v5  ;;  %v534_v5 = vld [vmem:[%s869_s0 + $0x10] sm:$0xf] }
  0x21   :  { %v605_v8 = vld.sshfl [vmem:[#allocation1] sm:$0xff pattern:$0x75316420] }
  0x22   :  { %54 = vst [vmem:[#allocation1 + $0x1] ss:$2 sm:$0xff] %v510_v7 }
  0x29   :  { %v610_v10 = vld.sshfl [vmem:[#allocation1] sm:$0xff pattern:$0x75316420] }
  0x2a   :  { %63 = vst [vmem:[#allocation1 + $0x1] ss:$2 sm:$0xff] %v511_v9  ;;  %v535_v9 = vld [vmem:[%s869_s0 + $0x14] sm:$0xf] }
  0x31   :  { %v615_v12 = vld.sshfl [vmem:[#allocation1] sm:$0xff pattern:$0x75316420] }
  0x32   :  { %71 = vst [vmem:[#allocation1] ss:$2 sm:$0xff] %v69_v11 }
  0x39   :  { %v620_v14 = vld.sshfl [vmem:[#allocation1] sm:$0xff pattern:$0x75316420] }
  0x3a   :  { %79 = vst [vmem:[#allocation1] ss:$2 sm:$0xff] %v77_v13  ;;  %v327_v13 = vld [vmem:[%s869_s0] sm:$0xf] }
  0x41   :  { %v625_v16 = vld.sshfl [vmem:[#allocation1] sm:$0xff pattern:$0x75316420] }
  0x42   :  { %89 = vst [vmem:[#allocation1 + $0x1] ss:$2 sm:$0xff] %v512_v15 }
  0x49   :  { %v630_v18 = vld.sshfl [vmem:[#allocation1] sm:$0xff pattern:$0x75316420] }
  0x4a   :  { %96 = vst [vmem:[#allocation1 + $0x1] ss:$2 sm:$0xff] %v513_v17  ;;  %v335_v17 = vld [vmem:[%s869_s0 + $0x4] sm:$0xf] }
  0x4b   :  { %92 = vst.msk [vmem:[#allocation2 + $0x20] sm:$0xf0] %vm26_vm1, %v630_v18 }
  0x51   :  { %v635_v20 = vld.sshfl [vmem:[#allocation1] sm:$0xff pattern:$0x75316420] }
  0x52   :  { %108 = vst [vmem:[#allocation1 + $0x1] ss:$2 sm:$0xff] %v516_v19 }
  0x53   :  { %99 = vst.msk [vmem:[#allocation2 + $0x28] sm:$0xf0] %vm26_vm1, %v635_v20 }
  0x59   :  { %v640_v22 = vld.sshfl [vmem:[#allocation1] sm:$0xff pattern:$0x75316420] }
  0x5a   :  { %117 = vst [vmem:[#allocation1 + $0x1] ss:$2 sm:$0xff] %v517_v21  ;;  %v536_v21 = vld [vmem:[%s869_s0 + $0x8] sm:$0xf] }
  0x61   :  { %v645_v24 = vld.sshfl [vmem:[#allocation1] sm:$0xff pattern:$0x75316420] }
  0x62   :  { %125 = vst [vmem:[#allocation1] ss:$2 sm:$0xff] %v518_v23 }
  0x69   :  { %v126_v26 = vld.sshfl [vmem:[#allocation1] sm:$0xff pattern:$0x75316420] }
  0x6a   :  { %133 = vst [vmem:[#allocation1] ss:$2 sm:$0xff] %v519_v25  ;;  %127 = vrot.lane.b32.xlu0 %v126_v26, %s555_s13  ;;  %v537_v25 = vld [vmem:[%s869_s0 + $0xc] sm:$0xf] }
  0x71   :  { %v134_v28 = vld.sshfl [vmem:[#allocation1] sm:$0xff pattern:$0x75316420] }
  0x72   :  { %135 = vrot.lane.b32.xlu1 %v134_v28, %s555_s13  ;;  %142 = vst [vmem:[#allocation1 + $0x1] ss:$2 sm:$0xff] %v520_v27  ;;  %v361_v27 = vld [vmem:[%s869_s0] sm:$0xf] }
  0x79   :  { %v143_v30 = vld.sshfl [vmem:[#allocation1] sm:$0xff pattern:$0x75316420] }
  0x7a   :  { %151 = vst [vmem:[#allocation1 + $0x1] ss:$2 sm:$0xff] %v521_v29  ;;  %144 = vrot.lane.b32.xlu2 %v143_v30, %s556_s18  ;;  %v369_v29 = vld [vmem:[%s869_s0 + $0x4] sm:$0xf] }
  0x81   :  { %v662_v32 = vld.sshfl [vmem:[#allocation1] sm:$0xff pattern:$0x75316420] }
  0x82   :  { %159 = vst [vmem:[#allocation1] ss:$2 sm:$0xff] %v157_v31  ;;  %v538_v31 = vld [vmem:[%s869_s0 + $0x8] sm:$0xf] }
  0x89   :  { %v160_v34 = vld.sshfl [vmem:[#allocation1] sm:$0xff pattern:$0x75316420] }
  0x8a   :  { %167 = vst [vmem:[#allocation1] ss:$2 sm:$0xff] %v165_v33  ;;  %161 = vrot.lane.b32.xlu2 %v160_v34, %s557_s23  ;;  %v539_v34 = vld [vmem:[%s869_s0 + $0xc] sm:$0xf] }
  0x91   :  { %v168_v36 = vld.sshfl [vmem:[#allocation1] sm:$0xff pattern:$0x75316420] }
  0x92   :  { %176 = vst [vmem:[#allocation1 + $0x1] ss:$2 sm:$0xff] %v522_v35  ;;  %169 = vrot.lane.b32.xlu0 %v168_v36, %s557_s23  ;;  %v395_v36 = vld [vmem:[%s869_s0] sm:$0xf] }
  0x99   :  { %v177_v38 = vld.sshfl [vmem:[#allocation1] sm:$0xff pattern:$0x75316420] }
  0x9a   :  { %178 = vrot.lane.b32.xlu1 %v177_v38, %s557_s23  ;;  %185 = vst [vmem:[#allocation1 + $0x1] ss:$2 sm:$0xff] %v523_v37  ;;  %v403_v38 = vld [vmem:[%s869_s0 + $0x4] sm:$0xf] }
  0xa1   :  { %v186_v40 = vld.sshfl [vmem:[#allocation1] sm:$0xff pattern:$0x75316420] }
  0xa2   :  { %193 = vst [vmem:[#allocation1] ss:$2 sm:$0xff] %v191_v39  ;;  %187 = vrot.lane.b32.xlu2 %v186_v40, %s557_s23 }
  0xa9   :  { %v194_v42 = vld.sshfl [vmem:[#allocation1] sm:$0xff pattern:$0x75316420] }
  0xaa   :  { %195 = vrot.lane.b32.xlu1 %v194_v42, %s558_s5  ;;  %201 = vst [vmem:[#allocation1] ss:$2 sm:$0xff] %v199_v41 }
  0xb1   :  { %v202_v44 = vld.sshfl [vmem:[#allocation1] sm:$0xff pattern:$0x75316420] }
  0xb2   :  { %210 = vst [vmem:[#allocation1 + $0x1] ss:$2 sm:$0xff] %v524_v43  ;;  %203 = vrot.lane.b32.xlu2 %v202_v44, %s558_s5 }
  0xb9   :  { %v211_v46 = vld.sshfl [vmem:[#allocation1] sm:$0xff pattern:$0x75316420] }
  0xba   :  { %212 = vrot.lane.b32.xlu0 %v211_v46, %s558_s5  ;;  %219 = vst [vmem:[#allocation1 + $0x1] ss:$2 sm:$0xff] %v525_v45 }
  0xc1   :  { %v220_v48 = vld.sshfl [vmem:[#allocation1] sm:$0xff pattern:$0x75316420] }
  0xc2   :  { %221 = vrot.lane.b32.xlu1 %v220_v48, %s558_s5  ;;  %227 = vst [vmem:[#allocation1] ss:$2 sm:$0xff] %v225_v47 }
  0xc9   :  { %v228_v50 = vld.sshfl [vmem:[#allocation1] sm:$0xff pattern:$0x75316420] }
  0xca   :  { %229 = vrot.lane.b32.xlu0 %v228_v50, %s559_s15  ;;  %235 = vst [vmem:[#allocation1] ss:$2 sm:$0xff] %v233_v49 }
  0xd1   :  { %v236_v52 = vld.sshfl [vmem:[#allocation1] sm:$0xff pattern:$0x75316420] }
  0xd2   :  { %237 = vrot.lane.b32.xlu1 %v236_v52, %s559_s15  ;;  %244 = vst [vmem:[#allocation1 + $0x1] ss:$2 sm:$0xff] %v526_v51 }
  0xd4   :  { %v145_v40 = vpop.permute.xlu2 %144 }
  0xd5   :  { %147 = vst.msk [vmem:[#allocation2 + $0x40] sm:$0xf0] %vm26_vm1, %v145_v40 }
  0xd9   :  { %v245_v54 = vld.sshfl [vmem:[#allocation1] sm:$0xff pattern:$0x75316420] }
  0xda   :  { %253 = vst [vmem:[#allocation1 + $0x1] ss:$2 sm:$0xff] %v527_v53  ;;  %246 = vrot.lane.b32.xlu2 %v245_v54, %s557_s23 }
  0xe1   :  { %v254_v56 = vld.sshfl [vmem:[#allocation1] sm:$0xff pattern:$0x75316420] }
  0xe2   :  { %255 = vrot.lane.b32.xlu0 %v254_v56, %s557_s23  ;;  %261 = vst [vmem:[#allocation1] ss:$2 sm:$0xff] %v528_v55 }
  0xe9   :  { %v262_v58 = vld.sshfl [vmem:[#allocation1] sm:$0xff pattern:$0x75316420] }
  0xea   :  { %269 = vst [vmem:[#allocation1] ss:$2 sm:$0xff] %v529_v57  ;;  %263 = vrot.lane.b32.xlu2 %v262_v58, %s557_s23 }
  0xf1   :  { %v270_v60 = vld.sshfl [vmem:[#allocation1] sm:$0xff pattern:$0x75316420] }
  0xf2   :  { %278 = vst [vmem:[#allocation1 + $0x1] ss:$2 sm:$0xff] %v530_v59  ;;  %271 = vrot.lane.b32.xlu0 %v270_v60, %s557_s23 }
  0xf9   :  { %v279_v62 = vld.sshfl [vmem:[#allocation1] sm:$0xff pattern:$0x75316420] }
  0xfa   :  { %280 = vrot.lane.b32.xlu1 %v279_v62, %s558_s5  ;;  %287 = vst [vmem:[#allocation1 + $0x1] ss:$2 sm:$0xff] %v531_v61  ;;  %v514_v61 = vld [vmem:[%s869_s0 + $0x18] sm:$0xf]  ;;  %v515_v62 = vld [vmem:[%s869_s0 + $0x1c] sm:$0xf] }
  0xfb   :  { %102 = vst.msk [vmem:[#allocation2 + $0x30] sm:$0xf] %vm15_vm0, %v514_v61 }
  0xfc   :  { %104 = vst.msk [vmem:[#allocation2 + $0x38] sm:$0xf] %vm15_vm0, %v515_v62 }
 0x101   :  { %v288_v0 = vld.sshfl [vmem:[#allocation1] sm:$0xff pattern:$0x75316420] }
 0x102   :  { %295 = vst [vmem:[#allocation1] ss:$2 sm:$0xff] %v532_v63  ;;  %289 = vrot.lane.b32.xlu2 %v288_v0, %s558_s5 }
 0x109   :  { %v296_v3 = vld.sshfl [vmem:[#allocation1] sm:$0xff pattern:$0x75316420] }
 0x10a   :  { %297 = vrot.lane.b32.xlu1 %v296_v3, %s558_s5  ;;  %303 = vst [vmem:[#allocation1] ss:$2 sm:$0xff] %v533_v1 }
 0x111   :  { %v304_v7 = vld.sshfl [vmem:[#allocation1] sm:$0xff pattern:$0x75316420] }
 0x112   :  { %312 = vst [vmem:[#allocation1 + $0x1] ss:$2 sm:$0xff] %v534_v5  ;;  %305 = vrot.lane.b32.xlu2 %v304_v7, %s558_s5  ;;  %s560_s5 = smov 108   ;;  %v14_v7 = vld [vmem:[%s869_s0] sm:$0xf] }
 0x113   :  { %16 = vst.msk [vmem:[#allocation2] sm:$0xf] %vm15_vm0, %v14_v7 }
 0x119   :  { %v313_v11 = vld.sshfl [vmem:[#allocation1] sm:$0xff pattern:$0x75316420] }
 0x11a   :  { %314 = vrot.lane.b32.xlu0 %v313_v11, %s559_s15  ;;  %321 = vst [vmem:[#allocation1 + $0x1] ss:$2 sm:$0xff] %v535_v9  ;;  %v17_v9 = vld [vmem:[%s869_s0 + $0x4] sm:$0xf] }
 0x11b   :  { %18 = vst.msk [vmem:[#allocation2 + $0x8] sm:$0xf] %vm15_vm0, %v17_v9 }
 0x121   :  { %v322_v15 = vld.sshfl [vmem:[#allocation1] sm:$0xff pattern:$0x75316420] }
 0x122   :  { %323 = vrot.lane.b32.xlu1 %v322_v15, %s559_s15  ;;  %329 = vst [vmem:[#allocation1] ss:$2 sm:$0xff] %v327_v13 }
 0x129   :  { %v330_v19 = vld.sshfl [vmem:[#allocation1] sm:$0xff pattern:$0x75316420] }
 0x12a   :  { %331 = vrot.lane.b32.xlu0 %v330_v19, %s560_s5  ;;  %337 = vst [vmem:[#allocation1] ss:$2 sm:$0xff] %v335_v17  ;;  %v438_v19 = vld [vmem:[%s870_s2] sm:$0xff] }
 0x131   :  { %v338_v23 = vld.sshfl [vmem:[#allocation1] sm:$0xff pattern:$0x75316420] }
 0x132   :  { %339 = vrot.lane.b32.xlu1 %v338_v23, %s560_s5  ;;  %346 = vst [vmem:[#allocation1 + $0x1] ss:$2 sm:$0xff] %v536_v21  ;;  %v563_v21 = vmov 0  }
 0x133   :  { %554 = vset.pattern.permute.xlu0 %v563_v21 }
 0x139   :  { %v347_v26 = vld.sshfl [vmem:[#allocation1] sm:$0xff pattern:$0x75316420] }
 0x13a   :  { %355 = vst [vmem:[#allocation1 + $0x1] ss:$2 sm:$0xff] %v537_v25  ;;  %348 = vrot.lane.b32.xlu2 %v347_v26, %s560_s5 }
 0x141   :  { %v356_v28 = vld.sshfl [vmem:[#allocation1] sm:$0xff pattern:$0x75316420] }
 0x142   :  { %357 = vrot.lane.b32.xlu0 %v356_v28, %s560_s5  ;;  %363 = vst [vmem:[#allocation1] ss:$2 sm:$0xff] %v361_v27 }
 0x149   :  { %v364_v30 = vld.sshfl [vmem:[#allocation1] sm:$0xff pattern:$0x75316420] }
 0x14a   :  { %365 = vrot.lane.b32.xlu1 %v364_v30, %s561_s26  ;;  %371 = vst [vmem:[#allocation1] ss:$2 sm:$0xff] %v369_v29 }
 0x151   :  { %v372_v33 = vld.sshfl [vmem:[#allocation1] sm:$0xff pattern:$0x75316420] }
 0x152   :  { %373 = vrot.lane.b32.xlu1 %v372_v33, %s561_s26  ;;  %380 = vst [vmem:[#allocation1 + $0x1] ss:$2 sm:$0xff] %v538_v31 }
 0x159   :  { %v381_v35 = vld.sshfl [vmem:[#allocation1] sm:$0xff pattern:$0x75316420] }
 0x15a   :  { %389 = vst [vmem:[#allocation1 + $0x1] ss:$2 sm:$0xff] %v539_v34  ;;  %110 = vrot.lane.b32.xlu1 %v640_v22, %s555_s13  ;;  %382 = vrot.lane.b32.xlu2 %v381_v35, %s561_s26  ;;  %v136_v22 = vpop.permute.xlu1 %135 }
 0x15b   :  { %138 = vst.msk [vmem:[#allocation2 + $0x48] sm:$0xf] %vm15_vm0, %v136_v22 }
 0x161   :  { %v390_v37 = vld.sshfl [vmem:[#allocation1] sm:$0xff pattern:$0x75316420] }
 0x162   :  { %397 = vst [vmem:[#allocation1] ss:$2 sm:$0xff] %v395_v36  ;;  %81 = vrot.lane.b32.xlu1 %v625_v16, %s556_s18  ;;  %391 = vrot.lane.b32.xlu2 %v390_v37, %s561_s26  ;;  %v128_v16 = vpop.permute.xlu0 %127  ;;  %v179_v41 = vpop.permute.xlu1 %178 }
 0x163   :  { %130 = vst.msk [vmem:[#allocation2 + $0x40] sm:$0xf] %vm15_vm0, %v128_v16 }
 0x164   :  { %181 = vst.msk [vmem:[#allocation2 + $0x50] sm:$0xf0] %vm26_vm1, %v179_v41 }
 0x169   :  { %v398_v39 = vld.sshfl [vmem:[#allocation1] sm:$0xff pattern:$0x75316420] }
 0x16a   :  { %399 = vrot.lane.b32.xlu0 %v398_v39, %s562_s8  ;;  %405 = vst [vmem:[#allocation1] ss:$2 sm:$0xff] %v403_v38  ;;  %56 = vrot.lane.b32.xlu1 %v610_v10, %s555_s13  ;;  %v170_v2 = vpop.permute.xlu0 %169  ;;  %v196_v18 = vpop.permute.xlu1 %195  ;;  %v420_v36 = vld [vmem:[#allocation2 + $0x40] sm:$0xff] }
 0x16b   :  { %119 = vrot.lane.b32.xlu2 %v645_v24, %s555_s13  ;;  %v162_v24 = vpop.permute.xlu2 %161  ;;  %172 = vst.msk [vmem:[#allocation2 + $0x58] sm:$0xf] %vm15_vm0, %v170_v2 }
 0x16c   :  { %164 = vst.msk [vmem:[#allocation2 + $0x50] sm:$0xf] %vm15_vm0, %v162_v24 }
 0x16d   :  { %198 = vst.msk [vmem:[#allocation2 + $0x60] sm:$0xf] %vm15_vm0, %v196_v18  ;;  %v411_v18 = vld [vmem:[%s871_s1] sm:$0xff] }
 0x171   :  { %v406_v10 = vld.sshfl [vmem:[#allocation1] sm:$0xff pattern:$0x75316420] }
 0x172   :  { %407 = vrot.lane.b32.xlu0 %v406_v10, %s562_s8  ;;  %v213_v20 = vpop.permute.xlu0 %212  ;;  %v222_v42 = vpop.permute.xlu1 %221 }
 0x173   :  { %39 = vrot.lane.b32.xlu2 %v600_v6, %s555_s13  ;;  %v188_v4 = vpop.permute.xlu2 %187  ;;  %215 = vst.msk [vmem:[#allocation2 + $0x60] sm:$0xf0] %vm26_vm1, %v213_v20  ;;  %v422_v33 = vld [vmem:[#allocation2 + $0x50] sm:$0xff] }
 0x174   :  { %190 = vst.msk [vmem:[#allocation2 + $0x58] sm:$0xf0] %vm26_vm1, %v188_v4  ;;  %v412_v4 = vld [vmem:[#allocation2] sm:$0xff] }
 0x175   :  { %224 = vst.msk [vmem:[#allocation2 + $0x68] sm:$0xf0] %vm26_vm1, %v222_v42  ;;  %v413_v42 = vld [vmem:[#allocation2 + $0x8] sm:$0xff] }
 0x17a   :  { %153 = vrot.lane.b32.xlu0 %v662_v32, %s556_s18  ;;  %v230_v32 = vpop.permute.xlu0 %229  ;;  %v424_v30 = vld [vmem:[#allocation2 + $0x60] sm:$0xff] }
 0x17b   :  { %65 = vrot.lane.b32.xlu2 %v615_v12, %s555_s13  ;;  %v204_v6 = vpop.permute.xlu2 %203  ;;  %232 = vst.msk [vmem:[#allocation2 + $0x70] sm:$0xf] %vm15_vm0, %v230_v32  ;;  %v238_v12 = vpop.permute.xlu1 %237  ;;  %v423_v40 = vld [vmem:[#allocation2 + $0x58] sm:$0xff] }
 0x17c   :  { %206 = vst.msk [vmem:[#allocation2 + $0x68] sm:$0xf] %vm15_vm0, %v204_v6 }
 0x17d   :  { %240 = vst.msk [vmem:[#allocation2 + $0x78] sm:$0xf] %vm15_vm0, %v238_v12 }
 0x182   :  { %73 = vrot.lane.b32.xlu0 %v620_v14, %s556_s18  ;;  %v256_v44 = vpop.permute.xlu0 %255 }
 0x183   :  { %v247_v43 = vpop.permute.xlu2 %246  ;;  %258 = vst.msk [vmem:[#allocation2 + $0x78] sm:$0xf0] %vm26_vm1, %v256_v44  ;;  %v281_v45 = vpop.permute.xlu1 %280  ;;  %v425_v22 = vld [vmem:[#allocation2 + $0x68] sm:$0xff] }
 0x184   :  { %249 = vst.msk [vmem:[#allocation2 + $0x70] sm:$0xf0] %vm26_vm1, %v247_v43 }
 0x185   :  { %283 = vst.msk [vmem:[#allocation2 + $0x80] sm:$0xf0] %vm26_vm1, %v281_v45 }
 0x18a   :  { %47 = vrot.lane.b32.xlu0 %v605_v8, %s555_s13  ;;  %v272_v46 = vpop.permute.xlu0 %271  ;;  %v427_v39 = vld [vmem:[#allocation2 + $0x78] sm:$0xff] }
 0x18b   :  { %v264_v14 = vpop.permute.xlu2 %263  ;;  %274 = vst.msk [vmem:[#allocation2 + $0x88] sm:$0xf] %vm15_vm0, %v272_v46  ;;  %v298_v8 = vpop.permute.xlu1 %297  ;;  %v426_v28 = vld [vmem:[#allocation2 + $0x70] sm:$0xff] }
 0x18c   :  { %266 = vst.msk [vmem:[#allocation2 + $0x80] sm:$0xf] %vm15_vm0, %v264_v14 }
 0x18d   :  { %300 = vst.msk [vmem:[#allocation2 + $0x90] sm:$0xf] %vm15_vm0, %v298_v8 }
 0x192   :  { %v315_v48 = vpop.permute.xlu0 %314  ;;  %441 = vperm.xlu0 %554, %v438_v19  }
 0x193   :  { %v290_v47 = vpop.permute.xlu2 %289  ;;  %317 = vst.msk [vmem:[#allocation2 + $0x90] sm:$0xf0] %vm26_vm1, %v315_v48  ;;  %v428_v26 = vld [vmem:[#allocation2 + $0x80] sm:$0xff] }
 0x194   :  { %292 = vst.msk [vmem:[#allocation2 + $0x88] sm:$0xf0] %vm26_vm1, %v290_v47  ;;  %v324_v50 = vpop.permute.xlu1 %323 }
 0x195   :  { %326 = vst.msk [vmem:[#allocation2 + $0x98] sm:$0xf0] %vm26_vm1, %v324_v50 }
 0x19a   :  { %v430_v23 = vld [vmem:[#allocation2 + $0x90] sm:$0xff] }
 0x19b   :  { %v306_v49 = vpop.permute.xlu2 %305  ;;  %v429_v37 = vld [vmem:[#allocation2 + $0x88] sm:$0xff] }
 0x19c   :  { %308 = vst.msk [vmem:[#allocation2 + $0x98] sm:$0xf] %vm15_vm0, %v306_v49  ;;  %v332_v51 = vpop.permute.xlu0 %331 }
 0x19d   :  { %334 = vst.msk [vmem:[#allocation2 + $0xa0] sm:$0xf] %vm15_vm0, %v332_v51 }
 0x1a3   :  { %v349_v53 = vpop.permute.xlu2 %348  ;;  %v431_v34 = vld [vmem:[#allocation2 + $0x98] sm:$0xff] }
 0x1a4   :  { %v340_v52 = vpop.permute.xlu1 %339  ;;  %351 = vst.msk [vmem:[#allocation2 + $0xa0] sm:$0xf0] %vm26_vm1, %v349_v53 }
 0x1a5   :  { %342 = vst.msk [vmem:[#allocation2 + $0xa8] sm:$0xf] %vm15_vm0, %v340_v52 }
 0x1ab   :  { %v432_v17 = vld [vmem:[#allocation2 + $0xa0] sm:$0xff] }
 0x1b4   :  { %v358_v54 = vpop.permute.xlu0 %357  ;;  %v383_v55 = vpop.permute.xlu2 %382 }
 0x1b5   :  { %360 = vst.msk [vmem:[#allocation2 + $0xa8] sm:$0xf0] %vm26_vm1, %v358_v54 }
 0x1b6   :  { %385 = vst.msk [vmem:[#allocation2 + $0xb0] sm:$0xf0] %vm26_vm1, %v383_v55 }
 0x1bc   :  { %v366_v56 = vpop.permute.xlu1 %365  ;;  %v392_v57 = vpop.permute.xlu2 %391  ;;  %v433_v31 = vld [vmem:[#allocation2 + $0xa8] sm:$0xff] }
 0x1bd   :  { %368 = vst.msk [vmem:[#allocation2 + $0xb0] sm:$0xf] %vm15_vm0, %v366_v56 }
 0x1be   :  { %394 = vst.msk [vmem:[#allocation2 + $0xb8] sm:$0xf0] %vm26_vm1, %v392_v57 }
 0x1c4   :  { %v374_v58 = vpop.permute.xlu1 %373  ;;  %v434_v15 = vld [vmem:[#allocation2 + $0xb0] sm:$0xff] }
 0x1c5   :  { %376 = vst.msk [vmem:[#allocation2 + $0xb8] sm:$0xf] %vm15_vm0, %v374_v58  ;;  %v120_v59 = vpop.permute.xlu2 %119 }
 0x1c6   :  { %122 = vst.msk [vmem:[#allocation2 + $0x38] sm:$0xf0] %vm26_vm1, %v120_v59 }
 0x1cc   :  { %v111_v60 = vpop.permute.xlu1 %110  ;;  %v435_v29 = vld [vmem:[#allocation2 + $0xb8] sm:$0xff] }
 0x1cd   :  { %113 = vst.msk [vmem:[#allocation2 + $0x30] sm:$0xf0] %vm26_vm1, %v111_v60  ;;  %v40_v63 = vpop.permute.xlu2 %39  ;;  %v419_v2 = vld [vmem:[#allocation2 + $0x38] sm:$0xff] }
 0x1ce   :  { %42 = vst.msk [vmem:[#allocation2 + $0x10] sm:$0xf] %vm15_vm0, %v40_v63 }
 0x1d4   :  { %v82_v0 = vpop.permute.xlu1 %81  ;;  %v418_v38 = vld [vmem:[#allocation2 + $0x30] sm:$0xff] }
 0x1d5   :  { %84 = vst.msk [vmem:[#allocation2 + $0x28] sm:$0xf] %vm15_vm0, %v82_v0  ;;  %v66_v1 = vpop.permute.xlu2 %65 }
 0x1d6   :  { %68 = vst.msk [vmem:[#allocation2 + $0x18] sm:$0xf0] %vm26_vm1, %v66_v1 }
 0x1dc   :  { %v400_v3 = vpop.permute.xlu0 %399  ;;  %v57_v5 = vpop.permute.xlu1 %56  ;;  %v417_v20 = vld [vmem:[#allocation2 + $0x28] sm:$0xff] }
 0x1dd   :  { %402 = vst.msk [vmem:[#allocation2 + $0xc0] sm:$0xf] %vm15_vm0, %v400_v3 }
 0x1de   :  { %59 = vst.msk [vmem:[#allocation2 + $0x10] sm:$0xf0] %vm26_vm1, %v57_v5 }
 0x1e4   :  { %v408_v11 = vpop.permute.xlu0 %407  ;;  %v436_v13 = vld [vmem:[#allocation2 + $0xc0] sm:$0xf] }
 0x1e5   :  { %410 = vst.msk [vmem:[#allocation2 + $0xc8] sm:$0xf] %vm15_vm0, %v408_v11  ;;  %540 = vmatpush.msk.msra.mxu0 %vm448_vm2, %v436_v13  ;;  %v414_v41 = vld [vmem:[#allocation2 + $0x10] sm:$0xff] }
 0x1e7   :  { %459 = vmatpush.msra.mxu0 %v434_v15 }
 0x1e9   :  { %460 = vmatpush.msra.mxu0 %v432_v17 }
 0x1eb   :  { %461 = vmatpush.msra.mxu0 %v430_v23 }
 0x1ec   :  { %v154_v25 = vpop.permute.xlu0 %153  ;;  %v437_v27 = vld [vmem:[#allocation2 + $0xc8] sm:$0xf] }
 0x1ed   :  { %156 = vst.msk [vmem:[#allocation2 + $0x48] sm:$0xf0] %vm26_vm1, %v154_v25  ;;  %462 = vmatpush.msra.mxu0 %v428_v26  ;;  %542 = vmatpush.msk.msra.mxu1 %vm448_vm2, %v437_v27 }
 0x1ef   :  { %463 = vmatpush.msra.mxu0 %v426_v28  ;;  %479 = vmatpush.msra.mxu1 %v435_v29 }
 0x1f1   :  { %464 = vmatpush.msra.mxu0 %v424_v30  ;;  %480 = vmatpush.msra.mxu1 %v433_v31 }
 0x1f3   :  { %465 = vmatpush.msra.mxu0 %v422_v33  ;;  %481 = vmatpush.msra.mxu1 %v431_v34 }
 0x1f4   :  { %v74_v35 = vpop.permute.xlu0 %73  ;;  %v421_v24 = vld [vmem:[#allocation2 + $0x48] sm:$0xff] }
 0x1f5   :  { %76 = vst.msk [vmem:[#allocation2 + $0x20] sm:$0xf] %vm15_vm0, %v74_v35  ;;  %466 = vmatpush.msra.mxu0 %v420_v36  ;;  %482 = vmatpush.msra.mxu1 %v429_v37 }
 0x1f7   :  { %467 = vmatpush.msra.mxu0 %v418_v38  ;;  %483 = vmatpush.msra.mxu1 %v427_v39 }
 0x1f9   :  { %484 = vmatpush.msra.mxu1 %v425_v22 }
 0x1fb   :  { %485 = vmatpush.msra.mxu1 %v423_v40 }
 0x1fc   :  { %v48_v16 = vpop.permute.xlu0 %47  ;;  %v416_v10 = vld [vmem:[#allocation2 + $0x20] sm:$0xff] }
 0x1fd   :  { %50 = vst.msk [vmem:[#allocation2 + $0x18] sm:$0xf] %vm15_vm0, %v48_v16  ;;  %468 = vmatpush.msra.mxu0 %v416_v10  ;;  %486 = vmatpush.msra.mxu1 %v421_v24 }
 0x1ff   :  { %469 = vmatpush.msra.mxu0 %v414_v41  ;;  %487 = vmatpush.msra.mxu1 %v419_v2 }
 0x201   :  { %488 = vmatpush.msra.mxu1 %v417_v20  ;;  %470 = vmatpush.msra.mxu0 %v412_v4 }
 0x202   :  { %541 = vmatmul.msk.f32.vlgmr.msra.gmra.mxu0 %vm444_vm3, %v411_v18 }
 0x204   :  { %v415_v6 = vld [vmem:[#allocation2 + $0x18] sm:$0xff]  ;;  %v442_v32 = vpop.permute.xlu0 %441 }
 0x205   :  { %489 = vmatpush.msra.mxu1 %v415_v6 }
 0x207   :  { %490 = vmatpush.msra.mxu1 %v413_v42 }
 0x208   :  { %543 = vmatmul.msk.f32.vlgmr.msra.gmra.mxu1 %vm444_vm3, %v411_v18 }
 0x27f   :  { %v472_v12 = vpop.f32.mrf.mxu0 }
 0x280   :  { %v473_v43 = vadd.f32 %v472_v12, %v442_v32 }
 0x282   :  { %vm495_vm4 = vcmp.ge.f32.partialorder %v473_v43, 0.0  ;;  %v497_v44 = vmul.f32 0.2, %v473_v43 }
 0x284   :  { %v499_v14 = vsel %vm495_vm4, %v473_v43, %v497_v44 }
 0x285   :  { %501 = vst [vmem:[%s872_s3] sm:$0xff] %v499_v14  ;;  %v492_v45 = vpop.f32.mrf.mxu1 }
 0x286   :  { %v493_v46 = vadd.f32 %v492_v45, %v442_v32 }
 0x288   :  { %vm496_vm5 = vcmp.ge.f32.partialorder %v493_v46, 0.0  ;;  %v498_v47 = vmul.f32 0.2, %v493_v46 }
 0x28a   :  { %v500_v8 = vsel %vm496_vm5, %v493_v46, %v498_v47 }
 0x28b   :  { %544 = vst [vmem:[%s872_s3 + $0x8] sm:$0xff] %v500_v8 }

</bundles_post_ra>
